<compile_context>
chip_gen: v6e
topology: v6e:2x2x1
jax: 0.10.0
libtpu: 0.0.40
codegen_flags: <defaults>
</compile_context>

<pallas_src>
import functools

import jax
import jax.numpy as jnp
from jax.experimental import pallas as pl
from jax.experimental.pallas import tpu as pltpu

# Below this total size, a plain XLA gather beats the pallas_call fixed cost.
_MIN_PALLAS_BYTES = 256 * 1024


def _shuffle_kernel(idx_ref, x_ref, o_ref):
    # idx_ref lives in SMEM (scalar prefetch) and is consumed by the
    # index_maps; the body just moves the selected channel slab.
    del idx_ref
    o_ref[...] = x_ref[...]


def _round_up(n, m):
    return ((n + m - 1) // m) * m


def _vmem_budget_bytes():
    """(scoped VMEM limit, per-block budget).  Budget = (limit - headroom) / 4
    because the pipeline double-buffers both the input and the output block."""
    phys = None
    try:
        phys = getattr(pltpu.get_tpu_info(), "vmem_capacity_bytes", None)
    except Exception:
        phys = None
    if phys is None or phys <= 0:
        vmem_limit = 32 * 1024 * 1024          # safe default (v7x scoped default)
    else:
        # Half of physical VMEM, capped at 48 MiB:
        #   v5e/v6e (128 MiB phys) -> 48 MiB, v7x (64 MiB phys) -> 32 MiB.
        vmem_limit = min(phys // 2, 48 * 1024 * 1024)
    headroom = 4 * 1024 * 1024
    block_budget = max((vmem_limit - headroom) // 4, 1 * 1024 * 1024)
    return vmem_limit, block_budget


def _pick_row_tile(rows, bytes_per_row, budget_bytes, sub):
    """Largest multiple-of-`sub` row tile that fits `budget_bytes`.
    Need not divide `rows`; the grid uses cdiv and masks the edge tile."""
    if rows <= sub:
        return rows                                    # full dim (always legal)
    max_rows = max(budget_bytes // max(bytes_per_row, 1), sub)
    tr = (max_rows // sub) * sub
    if tr >= rows:
        return rows                                    # whole slab fits budget
    return tr


def _shuffle_pallas(x, idx):
    """out[:, c] = x[:, idx[c]] via a gather-in-index_map permuted copy."""
    B, C, H, W = x.shape
    itemsize = jnp.dtype(x.dtype).itemsize
    HW = H * W
    sub = max(8, 32 // itemsize)                       # native sublane multiple
    vmem_limit, block_budget = _vmem_budget_bytes()

    if HW % 128 == 0:
        # Lane-dense view of each channel slab: (H, W) -> (HW//128, 128).
        rows, lanes = HW // 128, 128
        xr = x.reshape(B, C, rows, lanes)
        tr = _pick_row_tile(rows, B * lanes * itemsize, block_budget, sub)
        n_r = pl.cdiv(rows, tr)
        # Keep >= 2 grid points when possible so v7x's two cores both work.
        if C * n_r < 2 and rows > sub:
            tr = max(sub, _round_up(pl.cdiv(rows, 2), sub))
            n_r = pl.cdiv(rows, tr)
        grid = (C, n_r)
        block = (B, 1, tr, lanes)
        in_spec = pl.BlockSpec(block, lambda c, r, idx_ref: (0, idx_ref[c], r, 0))
        out_spec = pl.BlockSpec(block, lambda c, r, idx_ref: (0, c, r, 0))
    else:
        # Contiguous full-HW run per channel: last block dim == full array dim,
        # so DMA bursts stay dense even for small W.  Tile over batch if the
        # (8-sublane-padded) slab would exceed the VMEM block budget.
        rows, lanes = 1, HW
        xr = x.reshape(B, C, rows, lanes)
        vmem_per_batch = 8 * _round_up(HW, 128) * itemsize
        tb = max(1, min(B, block_budget // max(vmem_per_batch, 1)))
        n_b = pl.cdiv(B, tb)
        grid = (C, n_b)
        block = (tb, 1, 1, lanes)
        in_spec = pl.BlockSpec(block, lambda c, b, idx_ref: (b, idx_ref[c], 0, 0))
        out_spec = pl.BlockSpec(block, lambda c, b, idx_ref: (b, c, 0, 0))

    out = pl.pallas_call(
        _shuffle_kernel,
        out_shape=jax.ShapeDtypeStruct((B, C, rows, lanes), x.dtype),
        grid_spec=pltpu.PrefetchScalarGridSpec(
            num_scalar_prefetch=1,
            grid=grid,
            in_specs=[in_spec],
            out_specs=out_spec,
        ),
        compiler_params=pltpu.CompilerParams(
            # every grid step writes a disjoint output block -> fully parallel
            dimension_semantics=("parallel", "parallel"),
            vmem_limit_bytes=vmem_limit,
        ),
        cost_estimate=pl.CostEstimate(
            flops=0,
            transcendentals=0,
            bytes_accessed=2 * x.size * itemsize,
        ),
    )(idx, xr)

    return out.reshape(B, C, H, W)


@functools.partial(jax.jit,
                   static_argnames=("rev", "cal_jacobian", "force_pallas"))
def shuffle_forward(x, perm, perm_inv, rev=False, cal_jacobian=False,
                    force_pallas=False):
    """Pallas equivalent of Shuffle.forward.

    x:        (B, C, H, W)  -- NCHW, same as PyTorch
    perm:     (C,) int32    -- forward permutation
    perm_inv: (C,) int32    -- inverse permutation
    """
    idx = perm_inv if rev else perm
    itemsize = jnp.dtype(x.dtype).itemsize
    total_bytes = x.size * itemsize

    if total_bytes < _MIN_PALLAS_BYTES and not force_pallas:
        # Tiny tensors: fixed pallas_call + per-step overheads dominate;
        # a plain XLA gather is faster and identical in semantics.
        out = jnp.take(x, idx, axis=1)
    else:
        out = _shuffle_pallas(x, idx)

    if cal_jacobian:
        # Shuffle._jacobian always returns 0.0 (permutation has |det| = 1).
        return out, jnp.float32(0.0)
    return out


def make_shuffle_params(flow_size, key):
    """Deterministic stand-in for torch.randperm in Shuffle.__init__."""
    perm = jax.random.permutation(key, flow_size).astype(jnp.int32)
    perm_inv = jnp.argsort(perm).astype(jnp.int32)
    return perm, perm_inv


if __name__ == "__main__":
    key = jax.random.PRNGKey(0)
    k_perm, k_x, k_x2 = jax.random.split(key, 3)

    B, C, H, W = 2, 4, 16, 16  # flow_size = C = 4
    perm, perm_inv = make_shuffle_params(C, k_perm)
    x = jax.random.normal(k_x, (B, C, H, W), dtype=jnp.float32)

    # Case 1: lane-dense path (HW % 128 == 0), forced through the Pallas kernel.
    y = shuffle_forward(x, perm, perm_inv, rev=False, force_pallas=True)
    y = jax.block_until_ready(y)

    x_rec, jac = shuffle_forward(y, perm, perm_inv, rev=True,
                                 cal_jacobian=True, force_pallas=True)
    x_rec = jax.block_until_ready(x_rec)

    assert jnp.allclose(y, x[:, perm]), "forward permutation mismatch"
    assert jnp.allclose(x_rec, x), "inverse permutation did not recover input"
    assert float(jac) == 0.0

    # Case 2: HW not a multiple of 128 -> contiguous full-HW fallback path.
    x2 = jax.random.normal(k_x2, (2, 4, 10, 10), dtype=jnp.float32)
    y2 = jax.block_until_ready(
        shuffle_forward(x2, perm, perm_inv, rev=False, force_pallas=True))
    assert jnp.allclose(y2, x2[:, perm]), "fallback path mismatch"

    # Case 3: tiny-tensor XLA bypass (default path for small shapes).
    y3 = jax.block_until_ready(shuffle_forward(x, perm, perm_inv))
    assert jnp.allclose(y3, x[:, perm]), "bypass path mismatch"

    print("KERNEL_OK")
</pallas_src>

<mosaic_0001>
module attributes {stable_mosaic.version = 11 : i64} {
  func.func @_shuffle_kernel(%arg0: i32, %arg1: i32, %arg2: memref<4xi32, #tpu.memory_space<smem>>, %arg3: memref<2x1x2x128xf32, #tpu.memory_space<vmem>>, %arg4: memref<2x1x2x128xf32, #tpu.memory_space<vmem>>) attributes {dimension_semantics = [#tpu.dimension_semantics<parallel>, #tpu.dimension_semantics<parallel>], iteration_bounds = array<i64: 4, 1>, scalar_prefetch = 1 : i64, scratch_operands = 0 : i64, tpu.core_type = #tpu.core_type<tc>, window_params = [{transform_indices = @transform_0, window_bounds = array<i64: 2, 1, 2, 128>}, {transform_indices = @transform_1, window_bounds = array<i64: 2, 1, 2, 128>}]} {
    %c0 = arith.constant 0 : index
    %c0_0 = arith.constant 0 : index
    %c0_1 = arith.constant 0 : index
    %c0_2 = arith.constant 0 : index
    %0 = vector.load %arg3[%c0, %c0_0, %c0_1, %c0_2] : memref<2x1x2x128xf32, #tpu.memory_space<vmem>>, vector<2x1x2x128xf32>
    %c0_3 = arith.constant 0 : index
    %c0_4 = arith.constant 0 : index
    %c0_5 = arith.constant 0 : index
    %c0_6 = arith.constant 0 : index
    %1 = vector.load %arg4[%c0_3, %c0_4, %c0_5, %c0_6] : memref<2x1x2x128xf32, #tpu.memory_space<vmem>>, vector<2x1x2x128xf32>
    tpu.vector_store %arg4[%c0_3, %c0_4, %c0_5, %c0_6], %0 {strides = array<i32>} : memref<2x1x2x128xf32, #tpu.memory_space<vmem>>, vector<2x1x2x128xf32>,
    return
  }
  func.func @transform_0(%arg0: i32, %arg1: i32, %arg2: memref<4xi32, #tpu.memory_space<smem>>) -> (i32, i32, i32, i32) {
    %0 = arith.index_cast %arg0 : i32 to index
    %1 = memref.load %arg2[%0] : memref<4xi32, #tpu.memory_space<smem>>
    %c0_i32 = arith.constant 0 : i32
    %c0_i32_0 = arith.constant 0 : i32
    %c0_i32_1 = arith.constant 0 : i32
    return %c0_i32, %1, %arg1, %c0_i32_0 : i32, i32, i32, i32
  }
  func.func @transform_1(%arg0: i32, %arg1: i32, %arg2: memref<4xi32, #tpu.memory_space<smem>>) -> (i32, i32, i32, i32) {
    %c0_i32 = arith.constant 0 : i32
    %c0_i32_0 = arith.constant 0 : i32
    %c0_i32_1 = arith.constant 0 : i32
    return %c0_i32, %arg0, %arg1, %c0_i32_0 : i32, i32, i32, i32
  }
}

</mosaic_0001>

<bundles_post_ra>
// kernel: shuffle_forward.1
= control target key start
LH: loop header
LB: loop body
LE: loop exit
PB: predicated region body
PF: predicated region fallthrough
CT: control target
= control target key end

     0   :  { %s552_s0 = inlined_call_operand.vmem [shape: s32[4], index: 0, kind: input, shape index: {}]   ;;  %s553_s1 = inlined_call_operand.vmem [shape: f32[2,4,2,128], index: 1, kind: input, shape index: {}]   ;;  %s554_s2 = inlined_call_operand.vmem [shape: f32[2,4,2,128], index: 2, kind: output, shape index: {}]  }
   0x1   :  { %s7_s11 = sshll.u32 %s552_s0, 4  ;;  %s8_s11 = int_to_ptr.vmem [resolvable:$true] %s7_s11 }
   0x2   :  { %s366_s12 = scalar_lea.vmem %s8_s11, 16  ;;  %p371_p1 = scmp.lt.s32.totalorder %s8_s11, %s8_s11 }
   0x3   :  { %p367_p0 = scmp.ne.s32.totalorder %s8_s11, %s366_s12  ;;  %p372_p2 = scmp.lt.s32.totalorder %s366_s12, %s366_s12 }
   0x5   :  { %p373_p3 = por %p372_p2, %p371_p1 }
   0x7   :  { %p374_p4 = pnand %p373_p3, %p367_p0 }
   0x9   :  { %377 = shalt.err (!%p374_p4)  }
   0xa   :  { %s436_s13 = smov [#allocation3]  }
   0xb   :  { %10 = dma.vmem_to_smem %s8_s11, 16, %s436_s13, [#allocation2] }
   0xc   :  { %406 = dma.done.wait [#allocation2], 16 }
   0xd   :  { %407 = vsyncadd [#allocation2], 4294967280 }
   0xe   :  { %12 = sfence }
   0xf   :  { %s455_s14 = smov 0   ;;  %s457_s15 = smov 0  }
  0x10   :  { %s459_s16 = smov 0   ;;  %s461_s0 = smov 0  }
  0x11   :  { %s463_s17 = smov 0   ;;  %s465_s18 = smov 0  }
  0x12   :  { %s467_s19 = smov 0  }
  0x13 LB: > { %s30_s20 = sadd.s32 1, %s430_s18  ;;  %s296_s21 = sadd.s32 4294967295, %s434_s19   ;;  %s434_s19 = sphi %s467_s19, %s18_s19   ;;  %s430_s18 = sphi %s465_s18, %s561_s18   ;;  %s426_s17 = sphi %s463_s17, %s560_s17   ;;  %s422_s0 = sphi %s461_s0, %s559_s0   ;;  %s418_s16 = sphi %s459_s16, %s558_s16   ;;  %s414_s15 = sphi %s457_s15, %s557_s15   ;;  %s410_s14 = sphi %s455_s14, %s556_s14  }
  0x14   : > { %p32_p5 = scmp.ge.s32.totalorder %s30_s20, 4  ;;  %s34_s22 = sld [smem:[#allocation3 + %s430_s18]] }
  0x15   : > { %p48_p6 = scmp.ne.s32.totalorder %s422_s0, %s418_s16  ;;  %p49_p7 = scmp.eq.s32.totalorder %s434_s19, 0 }
  0x16   : > { %s563_s20 = smov (%p32_p5, %s30_s20), 0  ;;  %s69_s23 = sadd.s32 1, %s414_s15 }
  0x17   : > { %s35_s24 = sld [smem:[#allocation3 + %s563_s20]]  ;;  %s64_s25 = ssub.s32 %s430_s18, %s563_s20 }
  0x18   : > { %p50_p8 = por %p49_p7, %p48_p6  ;;  %p67_p9 = scmp.eq.s32.totalorder %s64_s25, 0 }
  0x19   : > { %p79_p10 = scmp.ne.s32.totalorder %s414_s15, %s410_s14  ;;  %p80_p11 = scmp.eq.s32.totalorder %s296_s21, 3 }
  0x1a   : > { %s505_s26 = scalar_select %p67_p9, %s414_s15, %s69_s23  }
  0x1b   : > { %p507_p12 = por %p80_p11, %p79_p10  ;;  %s41_s29 = sadd.s32 1, %s422_s0 }
  0x1c   : > { %p299_p0 = scmp.ge.s32.totalorder %s434_s19, 4 }
  0x1d   : > { %s36_s28 = ssub.s32 %s34_s22, %s35_s24 }
  0x1e   : > { %p39_p13 = scmp.eq.s32.totalorder %s36_s28, 0  ;;  %102 = sbr.rel (%p299_p0) target bundleno = 46 (0x2e), region = 16 }
  0x20   : > { %s513_s30 = scalar_select %p39_p13, %s422_s0, %s41_s29  }
  0x23   : > { %105 = sbr.rel (!%p50_p8) target bundleno = 46 (0x2e), region = 20  ;;  %s107_s3 = sand.u32 (%p50_p8), 1, %s422_s0  }
  0x24   : > { %s110_s4 = sld [smem:[#allocation3 + %s430_s18]] (%p50_p8)  ;;  %s300_s5 = sshll.u32 (%p50_p8), %s107_s3, 2 }
  0x25   : > { %s109_s10 = scalar_lea.vmem (%p50_p8), [#allocation4], %s300_s5 }
  0x2a   : > { %s301_s6 = sshll.u32 %s110_s4, 1 }
  0x2b   : > { %s113_s9 = scalar_lea.vmem %s553_s1, %s301_s6 }
  0x2c   : > { %v130_v0 = vld [vmem:[%s113_s9] sm:$0x3]  ;;  %v132_v1 = vld [vmem:[%s113_s9 + $0x8] sm:$0x3] }
  0x2d   : > { %131 = vst [vmem:[%s109_s10] sm:$0x3] %v130_v0  ;;  %133 = vst [vmem:[%s109_s10 + $0x2] sm:$0x3] %v132_v1 }
  0x2e PF: > { %p302_p1 = scmp.ge.s32.totalorder %s434_s19, 1  ;;  %p152_p2 = scmp.lt.s32.totalorder %s434_s19, 5 }
  0x30   : > { %p153_p3 = pnand %p302_p1, %p152_p2 }
  0x31   : > { %s159_s11 = sand.u32 (!%p153_p3), 1, %s418_s16   ;;  %s174_s12 = sand.u32 (!%p153_p3), 1, %s410_s14  }
  0x32   : > { %156 = sbr.rel (%p153_p3) target bundleno = 65 (0x41), region = 54  ;;  %s303_s13 = sshll.u32 (!%p153_p3), %s159_s11, 2 }
  0x33   : > { %s304_s21 = sshll.u32 (!%p153_p3), %s174_s12, 2  ;;  %s161_s22 = scalar_lea.vmem (!%p153_p3), [#allocation4], %s303_s13 }
  0x34   : > { %s176_s23 = scalar_lea.vmem (!%p153_p3), [#allocation5], %s304_s21 }
  0x37   : > { %v178_v2 = vld [vmem:[%s161_s22] sm:$0xf]   ;;  %188 = sbr.rel (!%p507_p12) target bundleno = 65 (0x41), region = 62  ;;  %s306_s24 = sshll.u32 (%p507_p12), %s426_s17, 1 }
  0x38   : > { %180 = vst [vmem:[%s176_s23] sm:$0xf] %v178_v2   ;;  %s191_s29 = scalar_lea.vmem (%p507_p12), %s554_s2, %s306_s24 }
  0x3f   : > { %v208_v3 = vld [vmem:[%s176_s23] sm:$0x3]  ;;  %v210_v4 = vld [vmem:[%s176_s23 + $0x2] sm:$0x3] }
  0x40   : > { %209 = vst [vmem:[%s191_s29] sm:$0x3] %v208_v3  ;;  %211 = vst [vmem:[%s191_s29 + $0x8] sm:$0x3] %v210_v4 }
  0x41 PF: > { %s18_s19 = sadd.s32 1, %s434_s19   ;;  %s556_s14 = smov %s414_s15 }
  0x42   : > { %p15_p4 = scmp.ge.s32.totalorder %s18_s19, 6   ;;  %s557_s15 = smov %s505_s26 }
  0x43   : > { %s558_s16 = smov %s422_s0  ;;  %s559_s0 = smov %s513_s30 }
  0x44   : > { %s560_s17 = smov %s430_s18  ;;  %s561_s18 = smov %s563_s20 }
  0x45   :  { %17 = sbr.rel (!%p15_p4) target bundleno = 19 (0x13), region = 127 }

</bundles_post_ra>
